<compile_context>
chip_gen: v7x
topology: tpu7x:2x2x1
jax: 0.10.0
libtpu: 0.0.40
codegen_flags: <defaults>
</compile_context>

<pallas_src>
import functools

import jax
import jax.numpy as jnp
from jax.experimental import pallas as pl
from jax.experimental.pallas import tpu as pltpu


def _loglinear_kernel(x_ref, w_ref, o_ref, acc_ref, *, apply_sigmoid, d_total, d_block):
    # x_ref: (rows, 128, d_block) batch tile; w_ref: (1, 1, d_block);
    # o_ref: (rows, 128) lane-dense output slab; acc_ref: (rows, 128) f32 accumulator.
    k = pl.program_id(1)                      # reduction step over D (last grid axis)

    @pl.when(k == 0)
    def _():
        acc_ref[...] = jnp.zeros_like(acc_ref)

    x = x_ref[...].astype(jnp.float32)        # bf16 inputs upcast per-vreg; accumulate in f32
    w = w_ref[...].astype(jnp.float32)        # (1, 1, d_block) broadcasts over (rows, 128, d_block)
    prod = x * w                              # VPU
    if d_total % d_block != 0:
        # Partial last D tile: zero the out-of-range lanes so garbage/OOB data
        # (from x or w) never reaches the accumulator of a valid row.
        lane = jax.lax.broadcasted_iota(jnp.int32, prod.shape, dimension=2)
        prod = jnp.where(k * d_block + lane < d_total, prod, 0.0)
    acc_ref[...] += jnp.sum(prod, axis=-1)    # XLU lane reduction -> (rows, 128)
    # NOTE: the lane-reduce result is sublane-major while o_ref/acc are lane-major;
    # any relayout is XLU work hidden under the DMA-bound critical path (verified
    # design assumption from the review; re-check in a bundle dump if D shrinks).

    @pl.when(k == pl.num_programs(1) - 1)
    def _():
        s = acc_ref[...]
        if apply_sigmoid:
            # Exact sigmoid (matches the PyTorch reference bit-for-bit-ish); the exp
            # rides the EUP.  pl.reciprocal(1+exp(-s), approx=True) would move the
            # divide to the EUP too, at ~1e-3 relative error.
            s = 1.0 / (1.0 + jnp.exp(-s))
        o_ref[...] = s                        # lane-dense store (last dim = 128)


def _pick_vmem_limit_bytes():
    """Gen-gated scoped-VMEM budget: v5e/v6e have 128 MiB physical VMEM, v7x only
    64 MiB per TensorCore, so we only raise the limit (and tile size) where safe."""
    try:
        cap = pltpu.get_tpu_info().vmem_capacity_bytes
    except Exception:
        cap = None
    if cap is None:
        cap = 64 * 1024 * 1024                # conservative: assume v7x per-TC size
    if cap >= 96 * 1024 * 1024:               # v5e / v6e
        return 64 * 1024 * 1024
    return 32 * 1024 * 1024                   # v7x


def _choose_tiles(num_row_groups, dim, itemsize, vmem_limit_bytes, input_buffers):
    """Pick (rows_per_tile, d_block).

    Budget model per (row-group x D-lane): `input_buffers` pipelined copies of the
    DMA'd input tile in its own dtype + ~2 f32 temporaries for the in-kernel upcast
    and the product, with the last dim lane-padded to a multiple of 128.
    """
    dim_pad = pl.cdiv(dim, 128) * 128                       # lane padding in VMEM
    usable = (vmem_limit_bytes * 3) // 4                    # leave headroom for misc
    per_elem = 128 * (input_buffers * itemsize + 2 * 4)     # bytes per row-group per D-lane
    cap_elems = max(1, usable // per_elem)                  # rows * d_block budget

    if 8 * dim_pad <= cap_elems or num_row_groups * dim_pad <= cap_elems:
        # Whole D fits in one tile: single reduction step, size the batch tile.
        d_block = dim
        cap_rows = max(1, cap_elems // dim_pad)
        want_rows = max(1, pl.cdiv(num_row_groups, 4))      # >= ~4 grid steps (v7x 2 TCs)
        rows = min(cap_rows, want_rows, num_row_groups)
        if rows < num_row_groups:
            rows = max((rows // 8) * 8, 8)                  # (rows,128) block: rows % 8 == 0
            rows = min(rows, num_row_groups)
    else:
        # D too large for one tile even at 8 row-groups: split D onto a reduction axis.
        rows = min(8, num_row_groups)
        d_block = max(128, ((cap_elems // max(rows, 1)) // 128) * 128)
        d_block = min(d_block, dim_pad)
    return rows, d_block


def loglinear_forward(x, w, *, apply_sigmoid=False, use_pallas=None,
                      rows_per_tile=None, d_block=None, input_buffers=2):
    """x: (B, D); w: (1, D) = nn.Linear(D, 1, bias=False).weight. Returns (B, 1) float32.

    bf16 `x` is supported and halves HBM traffic (f32 accumulation in-kernel).
    `input_buffers` can be swept (2 vs 3) where the VMEM budget allows.
    """
    B, D = x.shape
    assert w.shape == (1, D)
    itemsize = jnp.dtype(x.dtype).itemsize

    if use_pallas is None:
        # Below this, launch + per-grid-step overhead dwarfs the ~KBs of work.
        use_pallas = B * D >= (1 << 18)
    if not use_pallas:
        out = jnp.dot(x.astype(jnp.float32), w.astype(jnp.float32).T)
        return 1.0 / (1.0 + jnp.exp(-out)) if apply_sigmoid else out

    # Pad only to a multiple of 128 (never to the tile size): no pad at all when
    # B % 128 == 0; partial batch tiles are handled by Pallas partial blocks.
    b_pad = pl.cdiv(B, 128) * 128
    if b_pad != B:
        x = jnp.pad(x, ((0, b_pad - B), (0, 0)))
    nrg = b_pad // 128                         # number of 128-row groups
    x3 = x.reshape(nrg, 128, D)                # free, contiguous split of the batch dim
    w3 = w.reshape(1, 1, D)                    # lane-dense weight row

    vmem_limit = _pick_vmem_limit_bytes()
    rows, td = _choose_tiles(nrg, D, itemsize, vmem_limit, input_buffers)
    if rows_per_tile is not None:
        rows = rows_per_tile
        assert rows == nrg or (rows % 8 == 0 and rows <= nrg)
    if d_block is not None:
        td = d_block
        assert td == D or td % 128 == 0

    grid_b = pl.cdiv(nrg, rows)
    grid_d = pl.cdiv(D, td)

    x_spec_kwargs = {} if input_buffers == 2 else {"pipeline_mode": pl.Buffered(input_buffers)}

    out = pl.pallas_call(
        functools.partial(_loglinear_kernel, apply_sigmoid=apply_sigmoid,
                          d_total=D, d_block=td),
        out_shape=jax.ShapeDtypeStruct((nrg, 128), jnp.float32),
        grid_spec=pltpu.PrefetchScalarGridSpec(
            num_scalar_prefetch=0,
            grid=(grid_b, grid_d),
            in_specs=[
                pl.BlockSpec((rows, 128, td), lambda i, k: (i, 0, k), **x_spec_kwargs),
                pl.BlockSpec((1, 1, td), lambda i, k: (0, 0, k)),
            ],
            out_specs=pl.BlockSpec((rows, 128), lambda i, k: (i, 0)),
            scratch_shapes=[pltpu.VMEM((rows, 128), jnp.float32)],
        ),
        compiler_params=pltpu.CompilerParams(
            dimension_semantics=("parallel", "arbitrary"),  # batch tiles across v7x's 2 TCs
            vmem_limit_bytes=vmem_limit,
        ),
        cost_estimate=pl.CostEstimate(
            flops=2 * B * D,
            transcendentals=B if apply_sigmoid else 0,
            bytes_accessed=B * D * itemsize + D * jnp.dtype(w.dtype).itemsize + B * 4,
        ),
    )(x3, w3)

    return out.reshape(b_pad, 1)[:B]


def loglinear_predict(x, w, **kwargs):
    """Mirrors LogLinear.predict: sigmoid(forward(x)), with the sigmoid fused in-kernel."""
    return loglinear_forward(x, w, apply_sigmoid=True, **kwargs)


if __name__ == "__main__":
    key = jax.random.PRNGKey(0)
    k_x, k_w = jax.random.split(key)

    embedding_dim = 300   # W2V/GloVe embedding size used by the assignment
    # nn.Linear default init: uniform(-1/sqrt(D), 1/sqrt(D)) (synthetic weights).
    bound = float(embedding_dim) ** -0.5
    w = jax.random.uniform(k_w, (1, embedding_dim), dtype=jnp.float32,
                           minval=-bound, maxval=bound)

    batch = 64
    x = jax.random.normal(k_x, (batch, embedding_dim), dtype=jnp.float32)
    ref = jnp.sum(x * w[0], axis=-1, keepdims=True)

    # Force the Pallas path even at demo size so the kernel is exercised.
    out = jax.block_until_ready(loglinear_forward(x, w, use_pallas=True))
    assert out.shape == (batch, 1)
    assert jnp.allclose(out, ref, atol=1e-5, rtol=1e-5)

    # predict() path with the fused sigmoid epilogue.
    pred = jax.block_until_ready(loglinear_predict(x, w, use_pallas=True))
    ref_pred = 1.0 / (1.0 + jnp.exp(-ref))
    assert pred.shape == (batch, 1)
    assert jnp.allclose(pred, ref_pred, atol=1e-5, rtol=1e-5)

    # Non-multiple-of-128 batch with a multi-step batch grid (exercises the
    # pad-to-128-only path and Pallas partial blocks).
    big_b = 2500
    xb = jax.random.normal(jax.random.PRNGKey(1), (big_b, embedding_dim), dtype=jnp.float32)
    refb = jnp.sum(xb * w[0], axis=-1, keepdims=True)
    outb = jax.block_until_ready(loglinear_forward(xb, w, use_pallas=True))
    assert outb.shape == (big_b, 1)
    assert jnp.allclose(outb, refb, atol=1e-5, rtol=1e-4)

    # Forced D-split path (reduction grid axis + f32 accumulator + tail mask).
    outd = jax.block_until_ready(loglinear_forward(xb, w, use_pallas=True, d_block=128))
    assert jnp.allclose(outd, refb, atol=1e-5, rtol=1e-4)

    # bf16 input path (halves HBM traffic; accumulation stays f32 in-kernel).
    x_bf = xb.astype(jnp.bfloat16)
    ref_bf = jnp.sum(x_bf.astype(jnp.float32) * w[0], axis=-1, keepdims=True)
    out_bf = jax.block_until_ready(loglinear_forward(x_bf, w, use_pallas=True))
    assert jnp.allclose(out_bf, ref_bf, atol=1e-4, rtol=1e-4)

    # Tiny-shape auto path (falls back to plain XLA; correctness only).
    small = jax.block_until_ready(loglinear_forward(x[:4], w))
    assert jnp.allclose(small, ref[:4], atol=1e-5, rtol=1e-5)

    print("KERNEL_OK")
</pallas_src>

<mosaic_0001>
module attributes {stable_mosaic.version = 11 : i64} {
  func.func @_loglinear_kernel(%arg0: i32, %arg1: i32, %arg2: memref<1x128x300xf32, #tpu.memory_space<vmem>>, %arg3: memref<1x1x300xf32, #tpu.memory_space<vmem>>, %arg4: memref<1x128xf32, #tpu.memory_space<vmem>>, %arg5: memref<1x128xf32, #tpu.memory_space<vmem>>) attributes {dimension_semantics = [#tpu.dimension_semantics<parallel>, #tpu.dimension_semantics<arbitrary>], iteration_bounds = array<i64: 1, 1>, scalar_prefetch = 0 : i64, scratch_operands = 1 : i64, tpu.core_type = #tpu.core_type<tc>, window_params = [{transform_indices = @transform_0, window_bounds = array<i64: 1, 128, 300>}, {transform_indices = @transform_1, window_bounds = array<i64: 1, 1, 300>}, {transform_indices = @transform_2, window_bounds = array<i64: 1, 128>}]} {
    %c0_i32 = arith.constant 0 : i32
    %0 = arith.cmpi eq, %arg1, %c0_i32 : i32
    %1 = arith.extui %0 : i1 to i32
    %c0_i32_0 = arith.constant 0 : i32
    %2 = arith.cmpi ne, %1, %c0_i32_0 : i32
    scf.if %2 {
      %cst_12 = arith.constant 0.000000e+00 : f32
      %14 = vector.broadcast %cst_12 : f32 to vector<1x128xf32>
      %c0_13 = arith.constant 0 : index
      %c0_14 = arith.constant 0 : index
      %15 = vector.load %arg5[%c0_13, %c0_14] : memref<1x128xf32, #tpu.memory_space<vmem>>, vector<1x128xf32>
      tpu.vector_store %arg5[%c0_13, %c0_14], %14 {strides = array<i32>} : memref<1x128xf32, #tpu.memory_space<vmem>>, vector<1x128xf32>,
    } else {
    }
    %c0 = arith.constant 0 : index
    %c0_1 = arith.constant 0 : index
    %c0_2 = arith.constant 0 : index
    %3 = vector.load %arg2[%c0, %c0_1, %c0_2] : memref<1x128x300xf32, #tpu.memory_space<vmem>>, vector<1x128x300xf32>
    %c0_3 = arith.constant 0 : index
    %c0_4 = arith.constant 0 : index
    %c0_5 = arith.constant 0 : index
    %4 = vector.load %arg3[%c0_3, %c0_4, %c0_5] : memref<1x1x300xf32, #tpu.memory_space<vmem>>, vector<1x1x300xf32>
    %5 = vector.broadcast %4 : vector<1x1x300xf32> to vector<1x128x300xf32>
    %6 = arith.mulf %3, %5 : vector<1x128x300xf32>
    %c0_6 = arith.constant 0 : index
    %c0_7 = arith.constant 0 : index
    %7 = vector.load %arg5[%c0_6, %c0_7] : memref<1x128xf32, #tpu.memory_space<vmem>>, vector<1x128xf32>
    %cst = arith.constant dense<0.000000e+00> : vector<1x128xf32>
    %8 = vector.multi_reduction <add>, %6, %cst [2] : vector<1x128x300xf32> to vector<1x128xf32>
    %9 = arith.addf %7, %8 : vector<1x128xf32>
    %c0_8 = arith.constant 0 : index
    %c0_9 = arith.constant 0 : index
    %10 = vector.load %arg5[%c0_8, %c0_9] : memref<1x128xf32, #tpu.memory_space<vmem>>, vector<1x128xf32>
    tpu.vector_store %arg5[%c0_8, %c0_9], %9 {strides = array<i32>} : memref<1x128xf32, #tpu.memory_space<vmem>>, vector<1x128xf32>,
    %c0_i32_10 = arith.constant 0 : i32
    %11 = arith.cmpi eq, %arg1, %c0_i32_10 : i32
    %12 = arith.extui %11 : i1 to i32
    %c0_i32_11 = arith.constant 0 : i32
    %13 = arith.cmpi ne, %12, %c0_i32_11 : i32
    scf.if %13 {
      %c0_12 = arith.constant 0 : index
      %c0_13 = arith.constant 0 : index
      %14 = vector.load %arg5[%c0_12, %c0_13] : memref<1x128xf32, #tpu.memory_space<vmem>>, vector<1x128xf32>
      %c0_14 = arith.constant 0 : index
      %c0_15 = arith.constant 0 : index
      %15 = vector.load %arg4[%c0_14, %c0_15] : memref<1x128xf32, #tpu.memory_space<vmem>>, vector<1x128xf32>
      tpu.vector_store %arg4[%c0_14, %c0_15], %14 {strides = array<i32>} : memref<1x128xf32, #tpu.memory_space<vmem>>, vector<1x128xf32>,
    } else {
    }
    return
  }
  func.func @transform_0(%arg0: i32, %arg1: i32) -> (i32, i32, i32) {
    %c0_i32 = arith.constant 0 : i32
    %c0_i32_0 = arith.constant 0 : i32
    return %arg0, %c0_i32, %arg1 : i32, i32, i32
  }
  func.func @transform_1(%arg0: i32, %arg1: i32) -> (i32, i32, i32) {
    %c0_i32 = arith.constant 0 : i32
    %c0_i32_0 = arith.constant 0 : i32
    %c0_i32_1 = arith.constant 0 : i32
    return %c0_i32, %c0_i32_0, %arg1 : i32, i32, i32
  }
  func.func @transform_2(%arg0: i32, %arg1: i32) -> (i32, i32) {
    %c0_i32 = arith.constant 0 : i32
    %c0_i32_0 = arith.constant 0 : i32
    return %arg0, %c0_i32 : i32, i32
  }
}

</mosaic_0001>

<bundles_post_ra>
// kernel: tpu_custom_call.1
= control target key start
LH: loop header
LB: loop body
LE: loop exit
PB: predicated region body
PF: predicated region fallthrough
CT: control target
= control target key end

     0   :  { %v67_v0 = vlaneseq  ;;  %vm132_vm0 = vcmask 359424   ;;  %s2321_s0 = inlined_call_operand.vmem [shape: f32[1,128,300], index: 0, kind: input, shape index: {}]   ;;  %s2322_s1 = inlined_call_operand.vmem [shape: f32[1,1,300], index: 1, kind: input, shape index: {}]   ;;  %s2323_s2 = inlined_call_operand.hbm [shape: f32[1,128], index: 2, kind: output, shape index: {}]  }
   0x1   :  { %v65_v2 = vld [vmem:[%s2322_s1] sm:$0x7]  ;;  %v18_v4 = vld [vmem:[%s2321_s0 + $0x8] sm:$0xff]  ;;  %v19_v8 = vld [vmem:[%s2321_s0 + $0x10] sm:$0xff] }
   0x2   :  { %v1769_v1 = vshrl.u32 %v67_v0, 7  ;;  %v17_v3 = vld [vmem:[%s2321_s0] sm:$0xff]  ;;  %v23_v9 = vld [vmem:[%s2321_s0 + $0x30] sm:$0xff]  ;;  %v24_v10 = vld [vmem:[%s2321_s0 + $0x38] sm:$0xff] }
   0x3   :  { %v25_v14 = vld [vmem:[%s2321_s0 + $0x40] sm:$0xff]  ;;  %v20_v15 = vld [vmem:[%s2321_s0 + $0x18] sm:$0xff]  ;;  %v22_v17 = vld [vmem:[%s2321_s0 + $0x28] sm:$0xff] }
   0x4   :  { %v1781_v5 = vsub.s32 0, %v1769_v1  ;;  %v1784_v6 = vsub.s32 1, %v1769_v1  ;;  %v1787_v7 = vsub.s32 2, %v1769_v1  ;;  %v21_v16 = vld [vmem:[%s2321_s0 + $0x20] sm:$0xff]  ;;  %v26_v18 = vld [vmem:[%s2321_s0 + $0x48] sm:$0xff]  ;;  %v27_v23 = vld [vmem:[%s2321_s0 + $0x50] sm:$0xff] }
   0x5   :  { %v28_v28 = vld [vmem:[%s2321_s0 + $0x58] sm:$0xff]  ;;  %v33_v34 = vld [vmem:[%s2321_s0 + $0x80] sm:$0xff]  ;;  %v34_v39 = vld [vmem:[%s2321_s0 + $0x88] sm:$0xff] }
   0x6   :  { %v1799_v11 = vrot.slane %v65_v2, %v1781_v5  ;;  %v1802_v12 = vrot.slane %v65_v2, %v1784_v6  ;;  %v1805_v13 = vrot.slane %v65_v2, %v1787_v7  ;;  %v32_v29 = vld [vmem:[%s2321_s0 + $0x78] sm:$0xff]  ;;  %v38_v40 = vld [vmem:[%s2321_s0 + $0xa8] sm:$0xff]  ;;  %v39_v41 = vld [vmem:[%s2321_s0 + $0xb0] sm:$0xff] }
   0x7   :  { %v40_v46 = vld [vmem:[%s2321_s0 + $0xb8] sm:$0xff]  ;;  %v29_v47 = vld [vmem:[%s2321_s0 + $0x60] sm:$0xff]  ;;  %v30_v52 = vld [vmem:[%s2321_s0 + $0x68] sm:$0xff] }
   0x8   :  { %v82_v19 = vmul.f32 %v1799_v11, %v17_v3  ;;  %v83_v20 = vmul.f32 %v1802_v12, %v18_v4  ;;  %v84_v21 = vmul.f32 %v1805_v13, %v19_v8  ;;  %v88_v22 = vmul.f32 %v1799_v11, %v23_v9  ;;  %v31_v53 = vld [vmem:[%s2321_s0 + $0x70] sm:$0xff]  ;;  %v44_v58 = vld [vmem:[%s2321_s0 + $0xd8] sm:$0xff]  ;;  %v45_v59 = vld [vmem:[%s2321_s0 + $0xe0] sm:$0xff] }
   0x9   :  { %v89_v24 = vmul.f32 %v1802_v12, %v24_v10  ;;  %v90_v25 = vmul.f32 %v1805_v13, %v25_v14  ;;  %v85_v26 = vmul.f32 %v1799_v11, %v20_v15  ;;  %v86_v27 = vmul.f32 %v1802_v12, %v21_v16  ;;  %v46_v2 = vld [vmem:[%s2321_s0 + $0xe8] sm:$0xff] }
   0xa   :  { %v131_v30 = vadd.f32 %v83_v20, %v82_v19  ;;  %v133_v31 = vsel %vm132_vm0, %v84_v21, 0.0  ;;  %v87_v32 = vmul.f32 %v1805_v13, %v22_v17  ;;  %v91_v33 = vmul.f32 %v1799_v11, %v26_v18  ;;  %v50_v9 = vld [vmem:[%s2321_s0 + $0x108] sm:$0xff] }
   0xb   :  { %v142_v35 = vadd.f32 %v89_v24, %v88_v22  ;;  %v143_v36 = vsel %vm132_vm0, %v90_v25, 0.0  ;;  %v137_v37 = vadd.f32 %v86_v27, %v85_v26  ;;  %v92_v38 = vmul.f32 %v1802_v12, %v27_v23 }
   0xc   :  { %v134_v42 = vadd.f32 %v133_v31, %v131_v30  ;;  %v138_v43 = vsel %vm132_vm0, %v87_v32, 0.0  ;;  %v93_v44 = vmul.f32 %v1805_v13, %v28_v28  ;;  %v97_v45 = vmul.f32 %v1799_v11, %v32_v29 }
   0xd   :  { %v144_v48 = vadd.f32 %v143_v36, %v142_v35  ;;  %v139_v49 = vadd.f32 %v138_v43, %v137_v37  ;;  %v147_v50 = vadd.f32 %v92_v38, %v91_v33  ;;  %v98_v51 = vmul.f32 %v1802_v12, %v33_v34 }
   0xe   :  { %135 = vadd.xlane.f32.xlu0 %v134_v42  ;;  %v148_v54 = vsel %vm132_vm0, %v93_v44, 0.0  ;;  %v99_v55 = vmul.f32 %v1805_v13, %v34_v39  ;;  %v103_v56 = vmul.f32 %v1799_v11, %v38_v40  ;;  %v104_v57 = vmul.f32 %v1802_v12, %v39_v41 }
   0xf   :  { %145 = vadd.xlane.f32.xlu1 %v144_v48  ;;  %v149_v60 = vadd.f32 %v148_v54, %v147_v50  ;;  %v157_v61 = vadd.f32 %v98_v51, %v97_v45  ;;  %v105_v62 = vmul.f32 %v1805_v13, %v40_v46  ;;  %v94_v63 = vmul.f32 %v1799_v11, %v29_v47 }
  0x10   :  { %v158_v3 = vsel %vm132_vm0, %v99_v55, 0.0  ;;  %v95_v4 = vmul.f32 %v1802_v12, %v30_v52  ;;  %v96_v8 = vmul.f32 %v1805_v13, %v31_v53 }
  0x11   :  { %7 = vsyncpa [#allocation4], 0  ;;  %v109_v10 = vmul.f32 %v1799_v11, %v44_v58  ;;  %v110_v14 = vmul.f32 %v1802_v12, %v45_v59  ;;  %v51_v15 = vld [vmem:[%s2321_s0 + $0x110] sm:$0xff]  ;;  %v36_v17 = vld [vmem:[%s2321_s0 + $0x98] sm:$0xff]  ;;  %v167_v18 = vadd.f32 %v104_v57, %v103_v56  ;;  %v111_v21 = vmul.f32 %v1805_v13, %v46_v2 }
  0x12   :  { %v35_v16 = vld [vmem:[%s2321_s0 + $0x90] sm:$0xff]  ;;  %140 = vadd.xlane.f32.xlu0 %v139_v49  ;;  %v152_v19 = vadd.f32 %v95_v4, %v94_v63  ;;  %v153_v20 = vsel %vm132_vm0, %v96_v8, 0.0  ;;  %v52_v22 = vld [vmem:[%s2321_s0 + $0x118] sm:$0xff]  ;;  %v37_v23 = vld [vmem:[%s2321_s0 + $0xa0] sm:$0xff]  ;;  %v159_v24 = vadd.f32 %v158_v3, %v157_v61  ;;  %v168_v25 = vsel %vm132_vm0, %v105_v62, 0.0 }
  0x13   :  { %150 = vadd.xlane.f32.xlu1 %v149_v60  ;;  %v177_v26 = vadd.f32 %v110_v14, %v109_v10  ;;  %v115_v27 = vmul.f32 %v1799_v11, %v50_v9  ;;  %v116_v29 = vmul.f32 %v1802_v12, %v51_v15  ;;  %v100_v30 = vmul.f32 %v1799_v11, %v35_v16  ;;  %v56_v35 = vld [vmem:[%s2321_s0 + $0x138] sm:$0xff]  ;;  %v41_v37 = vld [vmem:[%s2321_s0 + $0xc0] sm:$0xff]  ;;  %v42_v38 = vld [vmem:[%s2321_s0 + $0xc8] sm:$0xff] }
  0x14   :  { %v154_v28 = vadd.f32 %v153_v20, %v152_v19  ;;  %v101_v31 = vmul.f32 %v1802_v12, %v36_v17  ;;  %v178_v32 = vsel %vm132_vm0, %v111_v21, 0.0  ;;  %v117_v33 = vmul.f32 %v1805_v13, %v52_v22  ;;  %v43_v39 = vld [vmem:[%s2321_s0 + $0xd0] sm:$0xff]  ;;  %v57_v42 = vld [vmem:[%s2321_s0 + $0x140] sm:$0xff]  ;;  %v48_v44 = vld [vmem:[%s2321_s0 + $0xf8] sm:$0xff] }
  0x15   :  { %v102_v34 = vmul.f32 %v1805_v13, %v37_v23  ;;  %v169_v40 = vadd.f32 %v168_v25, %v167_v18  ;;  %v47_v43 = vld [vmem:[%s2321_s0 + $0xf0] sm:$0xff]  ;;  %v179_v45 = vadd.f32 %v178_v32, %v177_v26  ;;  %v187_v46 = vadd.f32 %v116_v29, %v115_v27  ;;  %v58_v48 = vld [vmem:[%s2321_s0 + $0x148] sm:$0xff]  ;;  %v49_v49 = vld [vmem:[%s2321_s0 + $0x100] sm:$0xff] }
  0x16   :  { %155 = vadd.xlane.f32.xlu0 %v154_v28  ;;  %v162_v36 = vadd.f32 %v101_v31, %v100_v30  ;;  %v188_v50 = vsel %vm132_vm0, %v117_v33, 0.0  ;;  %v106_v51 = vmul.f32 %v1799_v11, %v41_v37  ;;  %v107_v52 = vmul.f32 %v1802_v12, %v42_v38  ;;  %v53_v54 = vld [vmem:[%s2321_s0 + $0x120] sm:$0xff]  ;;  %v54_v55 = vld [vmem:[%s2321_s0 + $0x128] sm:$0xff]  ;;  %v55_v56 = vld [vmem:[%s2321_s0 + $0x130] sm:$0xff] }
  0x17   :  { %160 = vadd.xlane.f32.xlu1 %v159_v24  ;;  %v163_v41 = vsel %vm132_vm0, %v102_v34, 0.0  ;;  %v108_v53 = vmul.f32 %v1805_v13, %v43_v39  ;;  %v121_v57 = vmul.f32 %v1799_v11, %v56_v35  ;;  %v122_v58 = vmul.f32 %v1802_v12, %v57_v42  ;;  %v62_v62 = vld [vmem:[%s2321_s0 + $0x168] sm:$0xff]  ;;  %v63_v63 = vld [vmem:[%s2321_s0 + $0x170] sm:$0xff]  ;;  %v60_v16 = vld [vmem:[%s2321_s0 + $0x158] sm:$0xff] }
  0x18   :  { %v164_v47 = vadd.f32 %v163_v41, %v162_v36  ;;  %v112_v59 = vmul.f32 %v1799_v11, %v47_v43  ;;  %v113_v60 = vmul.f32 %v1802_v12, %v48_v44  ;;  %v123_v61 = vmul.f32 %v1805_v13, %v58_v48  ;;  %v59_v8 = vld [vmem:[%s2321_s0 + $0x150] sm:$0xff]  ;;  %v64_v18 = vld [vmem:[%s2321_s0 + $0x178] sm:$0xff]  ;;  %v61_v21 = vld [vmem:[%s2321_s0 + $0x160] sm:$0xff]  ;;  %s1752_s0 = smov [#allocation3]  }
  0x19   :  { %v172_v2 = vadd.f32 %v107_v52, %v106_v51  ;;  %v173_v3 = vsel %vm132_vm0, %v108_v53, 0.0  ;;  %v114_v4 = vmul.f32 %v1805_v13, %v49_v49  ;;  %v118_v10 = vmul.f32 %v1799_v11, %v53_v54  ;;  %s1711_s19 = sshll.u32 %s1752_s0, 4  ;;  %s1712_s19 = int_to_ptr.vmem [resolvable:$true] %s1711_s19 }
  0x1a   :  { %165 = vadd.xlane.f32.xlu0 %v164_v47  ;;  %v182_v9 = vadd.f32 %v113_v60, %v112_v59  ;;  %v119_v14 = vmul.f32 %v1802_v12, %v54_v55  ;;  %v120_v15 = vmul.f32 %v1805_v13, %v55_v56  ;;  %v189_v17 = vadd.f32 %v188_v50, %v187_v46  ;;  %s1725_s20 = scalar_lea.vmem %s1712_s19, 16  ;;  %s1729_s21 = scalar_lea.vmem %s1712_s19, 32 }
  0x1b   :  { %170 = vadd.xlane.f32.xlu1 %v169_v40  ;;  %v174_v19 = vadd.f32 %v173_v3, %v172_v2  ;;  %v183_v20 = vsel %vm132_vm0, %v114_v4, 0.0  ;;  %v197_v22 = vadd.f32 %v122_v58, %v121_v57  ;;  %v127_v23 = vmul.f32 %v1799_v11, %v62_v62  ;;  %p1726_p0 = scmp.ne.s32.totalorder %s1712_s19, %s1725_s20  ;;  %p1730_p1 = scmp.lt.s32.totalorder %s1712_s19, %s1712_s19 }
  0x1c   :  { %v128_v24 = vmul.f32 %v1802_v12, %v63_v63  ;;  %v124_v25 = vmul.f32 %v1799_v11, %v59_v8  ;;  %v184_v26 = vadd.f32 %v183_v20, %v182_v9  ;;  %v192_v27 = vadd.f32 %v119_v14, %v118_v10  ;;  %p1731_p2 = scmp.lt.s32.totalorder %s1729_s21, %s1725_s20 }
  0x1d   :  { %v125_v28 = vmul.f32 %v1802_v12, %v60_v16  ;;  %v198_v29 = vsel %vm132_vm0, %v123_v61, 0.0  ;;  %v129_v30 = vmul.f32 %v1805_v13, %v64_v18  ;;  %v193_v31 = vsel %vm132_vm0, %v120_v15, 0.0 }
  0x1e   :  { %175 = vadd.xlane.f32.xlu0 %v174_v19  ;;  %v126_v32 = vmul.f32 %v1805_v13, %v61_v21  ;;  %v207_v33 = vadd.f32 %v128_v24, %v127_v23  ;;  %v199_v34 = vadd.f32 %v198_v29, %v197_v22  ;;  %v194_v35 = vadd.f32 %v193_v31, %v192_v27  ;;  %p1732_p3 = por %p1731_p2, %p1730_p1 }
  0x1f   :  { %180 = vadd.xlane.f32.xlu1 %v179_v45  ;;  %v202_v11 = vadd.f32 %v125_v28, %v124_v25  ;;  %v208_v36 = vsel %vm132_vm0, %v129_v30, 0.0  ;;  %v1749_v38 = vmov 0   ;;  %v1750_v13 = vmov 1966171168  }
  0x20   :  { %v203_v37 = vsel %vm132_vm0, %v126_v32, 0.0  ;;  %1723 = vset.pattern.permute.xlu0 %v1749_v38  ;;  %1724 = vset.pattern.permute.xlu1 %v1749_v38  ;;  %v209_v12 = vadd.f32 %v208_v36, %v207_v33  ;;  %v745_v40 = vunpack.c.l.s4 %v1750_v13  ;;  %v2001_v42 = vsub.s32 3, %v1769_v1  ;;  %p1733_p4 = pnand %p1732_p3, %p1726_p0 }
  0x21   :  { %v204_v39 = vadd.f32 %v203_v37, %v202_v11  ;;  %v2004_v43 = vsub.s32 4, %v1769_v1  ;;  %v2007_v44 = vsub.s32 5, %v1769_v1  ;;  %v2010_v45 = vsub.s32 6, %v1769_v1 }
  0x22   :  { %185 = vadd.xlane.f32.xlu0 %v184_v26  ;;  %v746_v41 = vunpack.c.0.s8 %v745_v40  ;;  %v2013_v46 = vsub.s32 7, %v1769_v1  ;;  %vm1583_vm1 = vcmask 130112   ;;  %vm1590_vm2 = vcmask 195712  }
  0x23   :  { %190 = vadd.xlane.f32.xlu1 %v189_v17  ;;  %vm1597_vm3 = vcmask 261312   ;;  %vm1604_vm4 = vcmask 326912   ;;  %vm1611_vm5 = vcmask 392512   ;;  %vm1618_vm6 = vcmask 458112  }
  0x24   :  { %v2016_v48 = vsub.s32 %v746_v41, %v1769_v1  ;;  %vm1625_vm7 = vcmask 523712   ;;  %vm1632_vm8 = vcmask 589312   ;;  %vm1639_vm9 = vcmask 654912  }
  0x25   :  { %vm1646_vm10 = vcmask 720512   ;;  %vm1653_vm11 = vcmask 786112   ;;  %vm1660_vm12 = vcmask 851712   ;;  %vm1667_vm13 = vcmask 917312  }
  0x26   :  { %195 = vadd.xlane.f32.xlu0 %v194_v35  ;;  %vm1674_vm14 = vcmask 982912   ;;  %vm1681_vm15 = vcmask 1048512  }
  0x27   :  { %200 = vadd.xlane.f32.xlu1 %v199_v34 }
  0x2a   :  { %205 = vadd.xlane.f32.xlu0 %v204_v39 }
  0x2b   :  { %210 = vadd.xlane.f32.xlu1 %v209_v12 }
  0x9b   :  { %v136_v47 = vpop.xlane.xlu0 %135 }
  0x9c   :  { %v146_v49 = vpop.xlane.xlu1 %145  ;;  %v231_v50 = vrot.slane %v136_v47, %v1781_v5  ;;  %v235_v51 = vrot.slane %v136_v47, %v1784_v6  ;;  %v239_v52 = vrot.slane %v136_v47, %v1787_v7  ;;  %v243_v53 = vrot.slane %v136_v47, %v2001_v42 }
  0x9d   :  { %v247_v54 = vrot.slane %v136_v47, %v2004_v43  ;;  %v251_v55 = vrot.slane %v136_v47, %v2007_v44  ;;  %v255_v56 = vrot.slane %v136_v47, %v2010_v45  ;;  %v259_v57 = vrot.slane %v136_v47, %v2013_v46 }
  0x9e   :  { %v740_v58 = vcombine.low %v231_v50, %v235_v51  ;;  %v741_v59 = vcombine.low %v239_v52, %v243_v53  ;;  %v295_v60 = vrot.slane %v146_v49, %v1781_v5  ;;  %v299_v61 = vrot.slane %v146_v49, %v1784_v6 }
  0x9f   :  { %v141_v62 = vpop.xlane.xlu0 %140  ;;  %v742_v63 = vcombine.low %v247_v54, %v251_v55  ;;  %v743_v2 = vcombine.low %v255_v56, %v259_v57  ;;  %v303_v3 = vrot.slane %v146_v49, %v1787_v7  ;;  %v307_v4 = vrot.slane %v146_v49, %v2001_v42 }
  0xa0   :  { %v2030_v8 = vpop.xlane.xlu1 %150  ;;  %v750_v9 = vrot.slane %v740_v58, %v2016_v48  ;;  %v757_v10 = vrot.slane %v741_v59, %v2016_v48  ;;  %v263_v14 = vrot.slane %v141_v62, %v1781_v5  ;;  %v267_v15 = vrot.slane %v141_v62, %v1784_v6 }
  0xa1   :  { %v764_v16 = vrot.slane %v742_v63, %v2016_v48  ;;  %v771_v17 = vrot.slane %v743_v2, %v2016_v48  ;;  %v271_v18 = vrot.slane %v141_v62, %v1787_v7  ;;  %v275_v19 = vrot.slane %v141_v62, %v2001_v42 }
  0xa2   :  { %v772_v20 = vcombine.low %v750_v9, %v757_v10  ;;  %v279_v21 = vrot.slane %v141_v62, %v2004_v43  ;;  %v283_v22 = vrot.slane %v141_v62, %v2007_v44  ;;  %v287_v23 = vrot.slane %v141_v62, %v2010_v45 }
  0xa3   :  { %v773_v24 = vcombine.low %v764_v16, %v771_v17  ;;  %v291_v25 = vrot.slane %v141_v62, %v2013_v46  ;;  %v789_v26 = vcombine.low %v263_v14, %v267_v15  ;;  %v790_v27 = vcombine.low %v271_v18, %v275_v19 }
  0xa4   :  { %v2044_v28 = vpop.xlane.xlu1 %160  ;;  %v780_v29 = vrot.slane %v772_v20, %v2016_v48  ;;  %v791_v30 = vcombine.low %v279_v21, %v283_v22  ;;  %v311_v31 = vrot.slane %v146_v49, %v2004_v43  ;;  %v315_v32 = vrot.slane %v146_v49, %v2007_v44 }
  0xa5   :  { %v787_v33 = vrot.slane %v773_v24, %v2016_v48  ;;  %v792_v34 = vcombine.low %v287_v23, %v291_v25  ;;  %v799_v35 = vrot.slane %v789_v26, %v2016_v48  ;;  %v806_v11 = vrot.slane %v790_v27, %v2016_v48 }
  0xa6   :  { %v813_v36 = vrot.slane %v791_v30, %v2016_v48  ;;  %v319_v37 = vrot.slane %v146_v49, %v2010_v45  ;;  %v323_v38 = vrot.slane %v146_v49, %v2013_v46  ;;  %v838_v12 = vcombine.low %v295_v60, %v299_v61  ;;  %v156_v61 = vpop.xlane.xlu0 %155 }
  0xa7   :  { %v788_v39 = vcombine.low %v780_v29, %v787_v33  ;;  %v820_v13 = vrot.slane %v792_v34, %v2016_v48  ;;  %v821_v40 = vcombine.low %v799_v35, %v806_v11  ;;  %v839_v41 = vcombine.low %v303_v3, %v307_v4 }
  0xa8   :  { %v840_v47 = vcombine.low %v311_v31, %v315_v32  ;;  %v841_v50 = vcombine.low %v319_v37, %v323_v38  ;;  %v848_v51 = vrot.slane %v838_v12, %v2016_v48  ;;  %v327_v52 = vrot.slane %v2030_v8, %v1781_v5  ;;  %v2059_v53 = vpop.xlane.xlu1 %170 }
  0xa9   :  { %1525 = vperm.xlu0 %1723, %v788_v39   ;;  %v822_v54 = vcombine.low %v813_v36, %v820_v13  ;;  %v829_v55 = vrot.slane %v821_v40, %v2016_v48  ;;  %v855_v49 = vrot.slane %v839_v41, %v2016_v48  ;;  %v331_v56 = vrot.slane %v2030_v8, %v1784_v6 }
  0xaa   :  { %v862_v57 = vrot.slane %v840_v47, %v2016_v48  ;;  %v869_v58 = vrot.slane %v841_v50, %v2016_v48  ;;  %v335_v59 = vrot.slane %v2030_v8, %v1787_v7  ;;  %v339_v60 = vrot.slane %v2030_v8, %v2001_v42 }
  0xab   :  { %v836_v62 = vrot.slane %v822_v54, %v2016_v48  ;;  %v870_v63 = vcombine.low %v848_v51, %v855_v49  ;;  %v343_v2 = vrot.slane %v2030_v8, %v2004_v43  ;;  %v347_v3 = vrot.slane %v2030_v8, %v2007_v44 }
  0xac   :  { %v871_v4 = vcombine.low %v862_v57, %v869_v58  ;;  %v351_v9 = vrot.slane %v2030_v8, %v2010_v45  ;;  %v355_v10 = vrot.slane %v2030_v8, %v2013_v46  ;;  %v887_v14 = vcombine.low %v327_v52, %v331_v56  ;;  %v181_v23 = vpop.xlane.xlu1 %180 }
  0xad   :  { %v837_v15 = vcombine.low %v829_v55, %v836_v62  ;;  %v878_v16 = vrot.slane %v870_v63, %v2016_v48  ;;  %v888_v17 = vcombine.low %v335_v59, %v339_v60  ;;  %v889_v18 = vcombine.low %v343_v2, %v347_v3 }
  0xae   :  { %v885_v19 = vrot.slane %v871_v4, %v2016_v48  ;;  %v890_v20 = vcombine.low %v351_v9, %v355_v10  ;;  %v897_v21 = vrot.slane %v887_v14, %v2016_v48  ;;  %v359_v22 = vrot.slane %v156_v61, %v1781_v5 }
  0xaf   :  { %1528 = vperm.xlu1 %1724, %v837_v15   ;;  %v904_v24 = vrot.slane %v888_v17, %v2016_v48  ;;  %v911_v25 = vrot.slane %v889_v18, %v2016_v48  ;;  %v363_v8 = vrot.slane %v156_v61, %v1784_v6  ;;  %v367_v26 = vrot.slane %v156_v61, %v1787_v7 }
  0xb0   :  { %v886_v27 = vcombine.low %v878_v16, %v885_v19  ;;  %v918_v29 = vrot.slane %v890_v20, %v2016_v48  ;;  %v371_v30 = vrot.slane %v156_v61, %v2001_v42  ;;  %v375_v31 = vrot.slane %v156_v61, %v2004_v43  ;;  %v191_v17 = vpop.xlane.xlu1 %190 }
  0xb1   :  { %v919_v32 = vcombine.low %v897_v21, %v904_v24  ;;  %v379_v33 = vrot.slane %v156_v61, %v2007_v44  ;;  %v383_v34 = vrot.slane %v156_v61, %v2010_v45  ;;  %v387_v35 = vrot.slane %v156_v61, %v2013_v46 }
  0xb2   :  { %v920_v11 = vcombine.low %v911_v25, %v918_v29  ;;  %v936_v36 = vcombine.low %v359_v22, %v363_v8  ;;  %v937_v37 = vcombine.low %v367_v26, %v371_v30  ;;  %v519_v38 = vrot.slane %v181_v23, %v1781_v5 }
  0xb3   :  { %1531 = vperm.xlu1 %1724, %v886_v27   ;;  %v927_v12 = vrot.slane %v919_v32, %v2016_v48  ;;  %v938_v39 = vcombine.low %v375_v31, %v379_v33  ;;  %v939_v13 = vcombine.low %v383_v34, %v387_v35  ;;  %v523_v40 = vrot.slane %v181_v23, %v1784_v6 }
  0xb4   :  { %v934_v41 = vrot.slane %v920_v11, %v2016_v48  ;;  %v946_v47 = vrot.slane %v936_v36, %v2016_v48  ;;  %v953_v50 = vrot.slane %v937_v37, %v2016_v48  ;;  %v527_v51 = vrot.slane %v181_v23, %v1787_v7 }
  0xb5   :  { %v960_v52 = vrot.slane %v938_v39, %v2016_v48  ;;  %v967_v54 = vrot.slane %v939_v13, %v2016_v48  ;;  %v531_v55 = vrot.slane %v181_v23, %v2001_v42  ;;  %v535_v49 = vrot.slane %v181_v23, %v2004_v43  ;;  %v166_v39 = vpop.xlane.xlu0 %165 }
  0xb6   :  { %v935_v56 = vcombine.low %v927_v12, %v934_v41  ;;  %v968_v57 = vcombine.low %v946_v47, %v953_v50  ;;  %v539_v58 = vrot.slane %v181_v23, %v2007_v44  ;;  %v543_v59 = vrot.slane %v181_v23, %v2010_v45 }
  0xb7   :  { %v969_v60 = vcombine.low %v960_v52, %v967_v54  ;;  %v547_v61 = vrot.slane %v181_v23, %v2013_v46  ;;  %v1181_v62 = vcombine.low %v519_v38, %v523_v40  ;;  %v1182_v63 = vcombine.low %v527_v51, %v531_v55 }
  0xb8   :  { %1534 = vperm.xlu1 %1724, %v935_v56   ;;  %v976_v2 = vrot.slane %v968_v57, %v2016_v48  ;;  %v1183_v3 = vcombine.low %v535_v49, %v539_v58  ;;  %v391_v4 = vrot.slane %v2044_v28, %v1781_v5  ;;  %v395_v9 = vrot.slane %v2044_v28, %v1784_v6 }
  0xb9   :  { %v983_v10 = vrot.slane %v969_v60, %v2016_v48  ;;  %v1184_v14 = vcombine.low %v543_v59, %v547_v61  ;;  %v1191_v15 = vrot.slane %v1181_v62, %v2016_v48  ;;  %v1198_v16 = vrot.slane %v1182_v63, %v2016_v48 }
  0xba   :  { %v1205_v18 = vrot.slane %v1183_v3, %v2016_v48  ;;  %v399_v19 = vrot.slane %v2044_v28, %v1787_v7  ;;  %v403_v20 = vrot.slane %v2044_v28, %v2001_v42  ;;  %v407_v21 = vrot.slane %v2044_v28, %v2004_v43 }
  0xbb   :  { %v984_v22 = vcombine.low %v976_v2, %v983_v10  ;;  %v1212_v23 = vrot.slane %v1184_v14, %v2016_v48  ;;  %v1213_v24 = vcombine.low %v1191_v15, %v1198_v16  ;;  %v411_v25 = vrot.slane %v2044_v28, %v2007_v44 }
  0xbc   :  { %v415_v8 = vrot.slane %v2044_v28, %v2010_v45  ;;  %v419_v26 = vrot.slane %v2044_v28, %v2013_v46  ;;  %v985_v27 = vcombine.low %v391_v4, %v395_v9  ;;  %v986_v29 = vcombine.low %v399_v19, %v403_v20  ;;  %v201_v4 = vpop.xlane.xlu1 %200 }
  0xbd   :  { %1537 = vperm.xlu1 %1724, %v984_v22   ;;  %v1214_v30 = vcombine.low %v1205_v18, %v1212_v23  ;;  %v1221_v31 = vrot.slane %v1213_v24, %v2016_v48  ;;  %v987_v32 = vcombine.low %v407_v21, %v411_v25  ;;  %v583_v33 = vrot.slane %v191_v17, %v1781_v5 }
  0xbe   :  { %v988_v34 = vcombine.low %v415_v8, %v419_v26  ;;  %v995_v35 = vrot.slane %v985_v27, %v2016_v48  ;;  %v1002_v11 = vrot.slane %v986_v29, %v2016_v48  ;;  %v587_v36 = vrot.slane %v191_v17, %v1784_v6 }
  0xbf   :  { %v1228_v37 = vrot.slane %v1214_v30, %v2016_v48  ;;  %v1009_v28 = vrot.slane %v987_v32, %v2016_v48  ;;  %v591_v38 = vrot.slane %v191_v17, %v1787_v7  ;;  %v595_v12 = vrot.slane %v191_v17, %v2001_v42 }
  0xc0   :  { %v1016_v13 = vrot.slane %v988_v34, %v2016_v48  ;;  %v1017_v40 = vcombine.low %v995_v35, %v1002_v11  ;;  %v599_v41 = vrot.slane %v191_v17, %v2004_v43  ;;  %v603_v47 = vrot.slane %v191_v17, %v2007_v44 }
  0xc1   :  { %v1229_v50 = vcombine.low %v1221_v31, %v1228_v37  ;;  %v607_v51 = vrot.slane %v191_v17, %v2010_v45  ;;  %v611_v52 = vrot.slane %v191_v17, %v2013_v46  ;;  %v1279_v54 = vcombine.low %v583_v33, %v587_v36 }
  0xc2   :  { %v1018_v55 = vcombine.low %v1009_v28, %v1016_v13  ;;  %v1025_v49 = vrot.slane %v1017_v40, %v2016_v48  ;;  %v1280_v56 = vcombine.low %v591_v38, %v595_v12  ;;  %v1281_v57 = vcombine.low %v599_v41, %v603_v47 }
  0xc3   :  { %1552 = vperm.xlu0 %1723, %v1229_v50   ;;  %v1282_v58 = vcombine.low %v607_v51, %v611_v52  ;;  %v1289_v59 = vrot.slane %v1279_v54, %v2016_v48  ;;  %v423_v60 = vrot.slane %v166_v39, %v1781_v5  ;;  %v427_v61 = vrot.slane %v166_v39, %v1784_v6 }
  0xc4   :  { %v1032_v62 = vrot.slane %v1018_v55, %v2016_v48  ;;  %v1296_v63 = vrot.slane %v1280_v56, %v2016_v48  ;;  %v1303_v2 = vrot.slane %v1281_v57, %v2016_v48  ;;  %v431_v3 = vrot.slane %v166_v39, %v1787_v7 }
  0xc5   :  { %v1310_v9 = vrot.slane %v1282_v58, %v2016_v48  ;;  %v435_v10 = vrot.slane %v166_v39, %v2001_v42  ;;  %v439_v14 = vrot.slane %v166_v39, %v2004_v43  ;;  %v443_v15 = vrot.slane %v166_v39, %v2007_v44 }
  0xc6   :  { %v1033_v16 = vcombine.low %v1025_v49, %v1032_v62  ;;  %v1311_v17 = vcombine.low %v1289_v59, %v1296_v63  ;;  %v447_v18 = vrot.slane %v166_v39, %v2010_v45  ;;  %v451_v19 = vrot.slane %v166_v39, %v2013_v46  ;;  %v211_v49 = vpop.xlane.xlu1 %210 }
  0xc7   :  { %v1312_v20 = vcombine.low %v1303_v2, %v1310_v9  ;;  %v1034_v21 = vcombine.low %v423_v60, %v427_v61  ;;  %v1035_v22 = vcombine.low %v431_v3, %v435_v10  ;;  %v1036_v23 = vcombine.low %v439_v14, %v443_v15  ;;  %v176_v10 = vpop.xlane.xlu0 %175 }
  0xc8   :  { %1540 = vperm.xlu1 %1724, %v1033_v16   ;;  %v1319_v24 = vrot.slane %v1311_v17, %v2016_v48  ;;  %v1037_v25 = vcombine.low %v447_v18, %v451_v19  ;;  %v647_v8 = vrot.slane %v201_v4, %v1781_v5  ;;  %v651_v26 = vrot.slane %v201_v4, %v1784_v6 }
  0xc9   :  { %v1326_v27 = vrot.slane %v1312_v20, %v2016_v48  ;;  %v1044_v29 = vrot.slane %v1034_v21, %v2016_v48  ;;  %v1051_v30 = vrot.slane %v1035_v22, %v2016_v48  ;;  %v1058_v31 = vrot.slane %v1036_v23, %v2016_v48 }
  0xca   :  { %v1065_v32 = vrot.slane %v1037_v25, %v2016_v48  ;;  %v655_v33 = vrot.slane %v201_v4, %v1787_v7  ;;  %v659_v34 = vrot.slane %v201_v4, %v2001_v42  ;;  %v663_v35 = vrot.slane %v201_v4, %v2004_v43 }
  0xcb   :  { %v1327_v11 = vcombine.low %v1319_v24, %v1326_v27  ;;  %v1066_v36 = vcombine.low %v1044_v29, %v1051_v30  ;;  %v667_v37 = vrot.slane %v201_v4, %v2007_v44  ;;  %v671_v28 = vrot.slane %v201_v4, %v2010_v45 }
  0xcc   :  { %v1067_v38 = vcombine.low %v1058_v31, %v1065_v32  ;;  %v675_v12 = vrot.slane %v201_v4, %v2013_v46  ;;  %v1377_v39 = vcombine.low %v647_v8, %v651_v26  ;;  %v1378_v13 = vcombine.low %v655_v33, %v659_v34 }
  0xcd   :  { %1558 = vperm.xlu0 %1723, %v1327_v11   ;;  %v1074_v40 = vrot.slane %v1066_v36, %v2016_v48  ;;  %v1379_v41 = vcombine.low %v663_v35, %v667_v37  ;;  %v455_v47 = vrot.slane %v2059_v53, %v1781_v5  ;;  %v459_v50 = vrot.slane %v2059_v53, %v1784_v6  ;;  %v186_v36 = vpop.xlane.xlu0 %185 }
  0xce   :  { %v1081_v51 = vrot.slane %v1067_v38, %v2016_v48  ;;  %v1380_v52 = vcombine.low %v671_v28, %v675_v12  ;;  %v1387_v54 = vrot.slane %v1377_v39, %v2016_v48  ;;  %v1394_v55 = vrot.slane %v1378_v13, %v2016_v48 }
  0xcf   :  { %v1401_v56 = vrot.slane %v1379_v41, %v2016_v48  ;;  %v463_v57 = vrot.slane %v2059_v53, %v1787_v7  ;;  %v467_v58 = vrot.slane %v2059_v53, %v2001_v42  ;;  %v471_v59 = vrot.slane %v2059_v53, %v2004_v43 }
  0xd0   :  { %v1082_v60 = vcombine.low %v1074_v40, %v1081_v51  ;;  %v1408_v61 = vrot.slane %v1380_v52, %v2016_v48  ;;  %v1409_v62 = vcombine.low %v1387_v54, %v1394_v55  ;;  %v475_v63 = vrot.slane %v2059_v53, %v2007_v44 }
  0xd1   :  { %v479_v2 = vrot.slane %v2059_v53, %v2010_v45  ;;  %v483_v3 = vrot.slane %v2059_v53, %v2013_v46  ;;  %v1083_v4 = vcombine.low %v455_v47, %v459_v50  ;;  %v1084_v9 = vcombine.low %v463_v57, %v467_v58 }
  0xd2   :  { %1543 = vperm.xlu1 %1724, %v1082_v60   ;;  %v1410_v14 = vcombine.low %v1401_v56, %v1408_v61  ;;  %v1417_v15 = vrot.slane %v1409_v62, %v2016_v48  ;;  %v1085_v16 = vcombine.low %v471_v59, %v475_v63  ;;  %v711_v17 = vrot.slane %v211_v49, %v1781_v5 }
  0xd3   :  { %v1086_v18 = vcombine.low %v479_v2, %v483_v3  ;;  %v1093_v19 = vrot.slane %v1083_v4, %v2016_v48  ;;  %v1100_v20 = vrot.slane %v1084_v9, %v2016_v48  ;;  %v715_v21 = vrot.slane %v211_v49, %v1784_v6  ;;  %v196_v3 = vpop.xlane.xlu0 %195 }
  0xd4   :  { %v1424_v22 = vrot.slane %v1410_v14, %v2016_v48  ;;  %v1107_v53 = vrot.slane %v1085_v16, %v2016_v48  ;;  %v719_v23 = vrot.slane %v211_v49, %v1787_v7  ;;  %v723_v24 = vrot.slane %v211_v49, %v2001_v42 }
  0xd5   :  { %v1114_v25 = vrot.slane %v1086_v18, %v2016_v48  ;;  %v1115_v8 = vcombine.low %v1093_v19, %v1100_v20  ;;  %v727_v26 = vrot.slane %v211_v49, %v2004_v43  ;;  %v731_v27 = vrot.slane %v211_v49, %v2007_v44 }
  0xd6   :  { %v1425_v29 = vcombine.low %v1417_v15, %v1424_v22  ;;  %v735_v30 = vrot.slane %v211_v49, %v2010_v45  ;;  %v739_v31 = vrot.slane %v211_v49, %v2013_v46  ;;  %v1475_v32 = vcombine.low %v711_v17, %v715_v21 }
  0xd7   :  { %v1116_v33 = vcombine.low %v1107_v53, %v1114_v25  ;;  %v1123_v34 = vrot.slane %v1115_v8, %v2016_v48  ;;  %v1476_v35 = vcombine.low %v719_v23, %v723_v24  ;;  %v1477_v11 = vcombine.low %v727_v26, %v731_v27 }
  0xd8   :  { %1564 = vperm.xlu0 %1723, %v1425_v29   ;;  %v1478_v37 = vcombine.low %v735_v30, %v739_v31  ;;  %v1485_v28 = vrot.slane %v1475_v32, %v2016_v48  ;;  %v487_v38 = vrot.slane %v176_v10, %v1781_v5  ;;  %v491_v12 = vrot.slane %v176_v10, %v1784_v6 }
  0xd9   :  { %v1130_v39 = vrot.slane %v1116_v33, %v2016_v48  ;;  %v1492_v13 = vrot.slane %v1476_v35, %v2016_v48  ;;  %v1499_v40 = vrot.slane %v1477_v11, %v2016_v48  ;;  %v495_v41 = vrot.slane %v176_v10, %v1787_v7 }
  0xda   :  { %v1506_v47 = vrot.slane %v1478_v37, %v2016_v48  ;;  %v499_v50 = vrot.slane %v176_v10, %v2001_v42  ;;  %v503_v51 = vrot.slane %v176_v10, %v2004_v43  ;;  %v507_v52 = vrot.slane %v176_v10, %v2007_v44 }
  0xdb   :  { %v1131_v54 = vcombine.low %v1123_v34, %v1130_v39  ;;  %v1507_v55 = vcombine.low %v1485_v28, %v1492_v13  ;;  %v511_v49 = vrot.slane %v176_v10, %v2010_v45  ;;  %v515_v56 = vrot.slane %v176_v10, %v2013_v46  ;;  %v206_v34 = vpop.xlane.xlu0 %205 }
  0xdc   :  { %v1508_v57 = vcombine.low %v1499_v40, %v1506_v47  ;;  %v1132_v58 = vcombine.low %v487_v38, %v491_v12  ;;  %v1133_v59 = vcombine.low %v495_v41, %v499_v50  ;;  %v1134_v60 = vcombine.low %v503_v51, %v507_v52 }
  0xdd   :  { %1546 = vperm.xlu1 %1724, %v1131_v54   ;;  %v1515_v61 = vrot.slane %v1507_v55, %v2016_v48  ;;  %v1135_v62 = vcombine.low %v511_v49, %v515_v56  ;;  %v551_v63 = vrot.slane %v186_v36, %v1781_v5  ;;  %v555_v2 = vrot.slane %v186_v36, %v1784_v6 }
  0xde   :  { %v1522_v4 = vrot.slane %v1508_v57, %v2016_v48  ;;  %v1142_v9 = vrot.slane %v1132_v58, %v2016_v48  ;;  %v1149_v14 = vrot.slane %v1133_v59, %v2016_v48  ;;  %v1156_v10 = vrot.slane %v1134_v60, %v2016_v48 }
  0xdf   :  { %v1163_v15 = vrot.slane %v1135_v62, %v2016_v48  ;;  %v559_v16 = vrot.slane %v186_v36, %v1787_v7  ;;  %v563_v17 = vrot.slane %v186_v36, %v2001_v42  ;;  %v567_v18 = vrot.slane %v186_v36, %v2004_v43 }
  0xe0   :  { %v1523_v19 = vcombine.low %v1515_v61, %v1522_v4  ;;  %v1164_v20 = vcombine.low %v1142_v9, %v1149_v14  ;;  %v571_v21 = vrot.slane %v186_v36, %v2007_v44  ;;  %v575_v22 = vrot.slane %v186_v36, %v2010_v45 }
  0xe1   :  { %v1165_v53 = vcombine.low %v1156_v10, %v1163_v15  ;;  %v579_v23 = vrot.slane %v186_v36, %v2013_v46  ;;  %v1230_v24 = vcombine.low %v551_v63, %v555_v2  ;;  %v1231_v25 = vcombine.low %v559_v16, %v563_v17 }
  0xe2   :  { %1570 = vperm.xlu0 %1723, %v1523_v19   ;;  %v1172_v8 = vrot.slane %v1164_v20, %v2016_v48  ;;  %v1232_v26 = vcombine.low %v567_v18, %v571_v21  ;;  %v615_v27 = vrot.slane %v196_v3, %v1781_v5  ;;  %v619_v29 = vrot.slane %v196_v3, %v1784_v6 }
  0xe3   :  { %v1179_v30 = vrot.slane %v1165_v53, %v2016_v48  ;;  %v1233_v31 = vcombine.low %v575_v22, %v579_v23  ;;  %v1240_v32 = vrot.slane %v1230_v24, %v2016_v48  ;;  %v1247_v33 = vrot.slane %v1231_v25, %v2016_v48 }
  0xe4   :  { %v1254_v35 = vrot.slane %v1232_v26, %v2016_v48  ;;  %v623_v11 = vrot.slane %v196_v3, %v1787_v7  ;;  %v627_v36 = vrot.slane %v196_v3, %v2001_v42  ;;  %v631_v37 = vrot.slane %v196_v3, %v2004_v43 }
  0xe5   :  { %v1180_v28 = vcombine.low %v1172_v8, %v1179_v30  ;;  %v1261_v38 = vrot.slane %v1233_v31, %v2016_v48  ;;  %v1262_v12 = vcombine.low %v1240_v32, %v1247_v33  ;;  %v635_v39 = vrot.slane %v196_v3, %v2007_v44 }
  0xe6   :  { %v639_v13 = vrot.slane %v196_v3, %v2010_v45  ;;  %v643_v40 = vrot.slane %v196_v3, %v2013_v46  ;;  %v1328_v41 = vcombine.low %v615_v27, %v619_v29  ;;  %v1329_v47 = vcombine.low %v623_v11, %v627_v36 }
  0xe7   :  { %1549 = vperm.xlu1 %1724, %v1180_v28   ;;  %v1263_v50 = vcombine.low %v1254_v35, %v1261_v38  ;;  %v1270_v51 = vrot.slane %v1262_v12, %v2016_v48  ;;  %v1330_v52 = vcombine.low %v631_v37, %v635_v39  ;;  %v679_v54 = vrot.slane %v206_v34, %v1781_v5 }
  0xe8   :  { %v1331_v55 = vcombine.low %v639_v13, %v643_v40  ;;  %v1338_v49 = vrot.slane %v1328_v41, %v2016_v48  ;;  %v1345_v56 = vrot.slane %v1329_v47, %v2016_v48  ;;  %v683_v57 = vrot.slane %v206_v34, %v1784_v6 }
  0xe9   :  { %v1277_v58 = vrot.slane %v1263_v50, %v2016_v48  ;;  %v1352_v59 = vrot.slane %v1330_v52, %v2016_v48  ;;  %v687_v60 = vrot.slane %v206_v34, %v1787_v7  ;;  %v691_v61 = vrot.slane %v206_v34, %v2001_v42 }
  0xea   :  { %v1359_v62 = vrot.slane %v1331_v55, %v2016_v48  ;;  %v1360_v63 = vcombine.low %v1338_v49, %v1345_v56  ;;  %v695_v5 = vrot.slane %v206_v34, %v2004_v43  ;;  %v699_v2 = vrot.slane %v206_v34, %v2007_v44 }
  0xeb   :  { %v1278_v3 = vcombine.low %v1270_v51, %v1277_v58  ;;  %v703_v4 = vrot.slane %v206_v34, %v2010_v45  ;;  %v707_v6 = vrot.slane %v206_v34, %v2013_v46  ;;  %v1426_v9 = vcombine.low %v679_v54, %v683_v57 }
  0xec   :  { %v1361_v14 = vcombine.low %v1352_v59, %v1359_v62  ;;  %v1368_v10 = vrot.slane %v1360_v63, %v2016_v48  ;;  %v1427_v15 = vcombine.low %v687_v60, %v691_v61  ;;  %v1428_v7 = vcombine.low %v695_v5, %v699_v2 }
  0xed   :  { %1555 = vperm.xlu1 %1724, %v1278_v3   ;;  %v1429_v42 = vcombine.low %v703_v4, %v707_v6  ;;  %v1436_v16 = vrot.slane %v1426_v9, %v2016_v48  ;;  %v1751_v53 = vmov 0.0   ;;  %v2273_v27 = vand.u32 127, %v67_v0 }
  0xee   :  { %v1375_v17 = vrot.slane %v1361_v14, %v2016_v48  ;;  %v1443_v43 = vrot.slane %v1427_v15, %v2016_v48  ;;  %v1450_v44 = vrot.slane %v1428_v7, %v2016_v48  ;;  %16 = vst [vmem:[#allocation2] sm:$0x1] %v1751_v53 }
  0xef   :  { %v1457_v45 = vrot.slane %v1429_v42, %v2016_v48  ;;  %v1578_v29 = vadd.s32 4294967288, %v2273_v27  ;;  %v1585_v31 = vadd.s32 4294967280, %v2273_v27  ;;  %v1592_v32 = vadd.s32 4294967272, %v2273_v27 }
  0xf0   :  { %v1376_v18 = vcombine.low %v1368_v10, %v1375_v17  ;;  %v1458_v46 = vcombine.low %v1436_v16, %v1443_v43  ;;  %v1599_v33 = vadd.s32 4294967264, %v2273_v27  ;;  %v1606_v35 = vadd.s32 4294967256, %v2273_v27 }
  0xf1   :  { %v1459_v19 = vcombine.low %v1450_v44, %v1457_v45  ;;  %v1581_v34 = vsub.s32 %v1578_v29, %v1769_v1  ;;  %v1588_v36 = vsub.s32 %v1585_v31, %v1769_v1  ;;  %v1613_v37 = vadd.s32 4294967248, %v2273_v27 }
  0xf2   :  { %1561 = vperm.xlu1 %1724, %v1376_v18   ;;  %v1466_v20 = vrot.slane %v1458_v46, %v2016_v48  ;;  %v1576_v0 = vsub.s32 %v2273_v27, %v1769_v1  ;;  %v1595_v28 = vsub.s32 %v1592_v32, %v1769_v1  ;;  %v1620_v38 = vadd.s32 4294967240, %v2273_v27 }
  0xf3   :  { %v1473_v21 = vrot.slane %v1459_v19, %v2016_v48  ;;  %v1602_v39 = vsub.s32 %v1599_v33, %v1769_v1  ;;  %v1627_v13 = vadd.s32 4294967232, %v2273_v27  ;;  %v1609_v41 = vsub.s32 %v1606_v35, %v1769_v1 }
  0xf4   :  { %v1616_v51 = vsub.s32 %v1613_v37, %v1769_v1  ;;  %v1623_v55 = vsub.s32 %v1620_v38, %v1769_v1  ;;  %v1641_v57 = vadd.s32 4294967216, %v2273_v27  ;;  %v1634_v59 = vadd.s32 4294967224, %v2273_v27 }
  0xf5   :  { %v1474_v22 = vcombine.low %v1466_v20, %v1473_v21  ;;  %v1630_v56 = vsub.s32 %v1627_v13, %v1769_v1  ;;  %v1648_v2 = vadd.s32 4294967208, %v2273_v27  ;;  %v1655_v7 = vadd.s32 4294967200, %v2273_v27  ;;  %v130_v38 = vld [vmem:[#allocation2] sm:$0x1] }
  0xf6   :  { %v1644_v14 = vsub.s32 %v1641_v57, %v1769_v1  ;;  %v1637_v10 = vsub.s32 %v1634_v59, %v1769_v1  ;;  %v1662_v43 = vadd.s32 4294967192, %v2273_v27  ;;  %v1669_v21 = vadd.s32 4294967184, %v2273_v27 }
  0xf7   :  { %1567 = vperm.xlu1 %1724, %v1474_v22   ;;  %v1651_v46 = vsub.s32 %v1648_v2, %v1769_v1  ;;  %v1658_v19 = vsub.s32 %v1655_v7, %v1769_v1  ;;  %v1676_v22 = vadd.s32 4294967176, %v2273_v27 }
  0xf8   :  { %v1672_v29 = vsub.s32 %v1669_v21, %v1769_v1 }
 0x128   :  { %v1526_v11 = vpop.permute.xlu0 %1525 }
 0x129   :  { %v1577_v52 = vrot.slane %v1526_v11, %v1576_v0 }
 0x12e   :  { %v1529_v23 = vpop.permute.xlu1 %1528 }
 0x12f   :  { %v1582_v40 = vrot.slane %v1529_v23, %v1581_v34 }
 0x131   :  { %v1584_v58 = vsel %vm1583_vm1, %v1582_v40, %v1577_v52 }
 0x132   :  { %v1532_v24 = vpop.permute.xlu1 %1531 }
 0x133   :  { %v1589_v47 = vrot.slane %v1532_v24, %v1588_v36 }
 0x135   :  { %v1591_v62 = vsel %vm1590_vm2, %v1589_v47, %v1584_v58 }
 0x137   :  { %v1535_v25 = vpop.permute.xlu1 %1534 }
 0x138   :  { %v1596_v54 = vrot.slane %v1535_v25, %v1595_v28 }
 0x13a   :  { %v1598_v5 = vsel %vm1597_vm3, %v1596_v54, %v1591_v62 }
 0x13c   :  { %v1538_v8 = vpop.permute.xlu1 %1537 }
 0x13d   :  { %v1603_v49 = vrot.slane %v1538_v8, %v1602_v39  ;;  %v1665_v8 = vsub.s32 %v1662_v43, %v1769_v1 }
 0x13f   :  { %v1605_v4 = vsel %vm1604_vm4, %v1603_v49, %v1598_v5 }
 0x142   :  { %v1553_v50 = vpop.permute.xlu0 %1552 }
 0x143   :  { %v1638_v18 = vrot.slane %v1553_v50, %v1637_v10 }
 0x147   :  { %v1541_v26 = vpop.permute.xlu1 %1540 }
 0x148   :  { %v1610_v60 = vrot.slane %v1541_v26, %v1609_v41 }
 0x14a   :  { %v1612_v15 = vsel %vm1611_vm5, %v1610_v60, %v1605_v4 }
 0x14c   :  { %v1559_v6 = vpop.permute.xlu0 %1558 }
 0x14d   :  { %v1652_v25 = vrot.slane %v1559_v6, %v1651_v46 }
 0x151   :  { %v1544_v30 = vpop.permute.xlu1 %1543 }
 0x152   :  { %v1617_v63 = vrot.slane %v1544_v30, %v1616_v51  ;;  %v1679_v30 = vsub.s32 %v1676_v22, %v1769_v1 }
 0x154   :  { %v1619_v42 = vsel %vm1618_vm6, %v1617_v63, %v1612_v15 }
 0x157   :  { %v1565_v20 = vpop.permute.xlu0 %1564 }
 0x158   :  { %v1666_v34 = vrot.slane %v1565_v20, %v1665_v8 }
 0x15c   :  { %v1547_v12 = vpop.permute.xlu1 %1546 }
 0x15d   :  { %v1624_v3 = vrot.slane %v1547_v12, %v1623_v55 }
 0x15f   :  { %v1626_v16 = vsel %vm1625_vm7, %v1624_v3, %v1619_v42 }
 0x161   :  { %v1571_v32 = vpop.permute.xlu0 %1570 }
 0x162   :  { %v1680_v11 = vrot.slane %v1571_v32, %v1679_v30 }
 0x166   :  { %v1550_v61 = vpop.permute.xlu1 %1549 }
 0x167   :  { %v1631_v9 = vrot.slane %v1550_v61, %v1630_v56 }
 0x169   :  { %v1633_v44 = vsel %vm1632_vm8, %v1631_v9, %v1626_v16 }
 0x16a   :  { %v1640_v53 = vsel %vm1639_vm9, %v1638_v18, %v1633_v44 }
 0x16c   :  { %v1556_v17 = vpop.permute.xlu1 %1555 }
 0x16d   :  { %v1645_v45 = vrot.slane %v1556_v17, %v1644_v14 }
 0x16f   :  { %v1647_v23 = vsel %vm1646_vm10, %v1645_v45, %v1640_v53 }
 0x170   :  { %v1654_v31 = vsel %vm1653_vm11, %v1652_v25, %v1647_v23 }
 0x171   :  { %v1562_v24 = vpop.permute.xlu1 %1561 }
 0x172   :  { %v1659_v26 = vrot.slane %v1562_v24, %v1658_v19 }
 0x174   :  { %v1661_v33 = vsel %vm1660_vm12, %v1659_v26, %v1654_v31 }
 0x175   :  { %v1668_v36 = vsel %vm1667_vm13, %v1666_v34, %v1661_v33 }
 0x176   :  { %v1568_v27 = vpop.permute.xlu1 %1567 }
 0x177   :  { %v1673_v35 = vrot.slane %v1568_v27, %v1672_v29 }
 0x179   :  { %v1675_v37 = vsel %vm1674_vm14, %v1673_v35, %v1668_v36 }
 0x17a   :  { %v1682_v0 = vsel %vm1681_vm15, %v1680_v11, %v1675_v37 }
 0x17b   :  { %v1689_v28 = vrot.slane %v1682_v0, %v2016_v48 }
 0x17d   :  { %v1696_v12 = vrot.slane %v1689_v28, %v2016_v48 }
 0x17f   :  { %v1698_v39 = vadd.f32 %v1696_v12, %v130_v38 }
 0x181   :  { %1699 = vst [vmem:[#allocation2] sm:$0x1] %v1698_v39 }
 0x188   :  { %v1703_v1 = vld [vmem:[#allocation2] sm:$0x1] }
 0x189   :  { %1704 = vst [vmem:[#allocation3] sm:$0x1] %v1703_v1 }
 0x18a   :  { %1736 = shalt.err (!%p1733_p4)
}
 0x18b   :  { %s1737_s24 = scalar_lea.hbm %s2323_s2, 16 }
 0x18c   :  { %p1738_p5 = scmp.ne.s32.totalorder %s2323_s2, %s1737_s24  ;;  %p1741_p6 = scmp.lt.u32.totalorder %s1737_s24, %s2323_s2 }
 0x18e   :  { %p1743_p7 = pnand %p1741_p6, %p1738_p5 }
 0x190   :  { %1746 = shalt.err (!%p1743_p7)
}
 0x191   :  { %1714 = dma.vmem_to_hbm [thread:$0]  %s1712_s19, 16, %s2323_s2, [#allocation4]  }
 0x192   :  { %1747 = dma.done.wait [#allocation4], 16  }
 0x193   :  { %1748 = vsyncadd [#allocation4], 4294967280 }
 0x194   :  { %1718 = vsyncpa [#allocation4], 1 }

</bundles_post_ra>
